<compile_context>
chip_gen: v5e
topology: v5e:2x2
jax: 0.10.0
libtpu: 0.0.40
codegen_flags: <defaults>
</compile_context>

<pallas_src>
import jax
import jax.numpy as jnp
from jax.experimental import pallas as pl
from jax.experimental.pallas import tpu as pltpu


# ---------------------------------------------------------------------------
# Kernel
# ---------------------------------------------------------------------------
def _mlp_kernel(x_ref,
                w1_ref, b1_ref,
                w2_ref, b2_ref,
                w3_ref, b3_ref,
                w4_ref, b4_ref,
                w5_ref, b5_ref,
                o_ref):
    """Fused 5-layer MLP on one batch tile.

    Weights: bf16 [in, out] (whole-array resident blocks).  Biases: f32
    [1, out].  Activations stay f32; they are cast to bf16 just before each
    MXU matmul and the dot accumulates in f32 (preferred_element_type).
    Bias-add + ReLU run in f32 on the VPU and co-issue under the MXU pushes.
    """

    def layer(h, w_ref, b_ref, relu):
        y = jnp.dot(h.astype(w_ref.dtype), w_ref[...],
                    preferred_element_type=jnp.float32)
        y = y + b_ref[...]
        if relu:
            y = jnp.maximum(y, 0.0)
        return y

    h = x_ref[...]
    h = layer(h, w1_ref, b1_ref, relu=True)
    h = layer(h, w2_ref, b2_ref, relu=True)
    h = layer(h, w3_ref, b3_ref, relu=True)
    h = layer(h, w4_ref, b4_ref, relu=True)
    h = layer(h, w5_ref, b5_ref, relu=False)
    o_ref[...] = h.astype(o_ref.dtype)


# ---------------------------------------------------------------------------
# Helpers
# ---------------------------------------------------------------------------
def _round_up(x, m):
    return ((x + m - 1) // m) * m


def _choose_tile_b(batch):
    """Batch tile: multiple of 8, capped at 2048 rows.

    Small batches run as a single tile (per-step overhead ~0.35 us would not
    be amortized).  Large batches target >= 4 grid steps so v7x gets >= 2
    pipelined steps per TensorCore under dimension_semantics=("parallel",).
    """
    b8 = _round_up(max(batch, 1), 8)
    if b8 <= 1024:
        return b8                                   # single tile
    return min(2048, _round_up(pl.cdiv(b8, 4), 8))  # >= 4 steps, <= 2048 rows


def pack_params(params, weight_dtype=jnp.bfloat16):
    """One-time pre-pack: cast W to bf16, keep biases f32 as [1, out].

    `params` is a list of 5 (W [in, out] f32, b [out] or [1, out] f32) tuples,
    where W is the transpose of PyTorch nn.Linear's [out, in] weight.
    No feature padding is needed: all dims (64/256/256/128/64/out) either are
    kernel-internal or are passed as full-array blocks.
    """
    packed = []
    for w, b in params:
        w_p = jnp.asarray(w, weight_dtype)
        b_p = jnp.asarray(b, jnp.float32).reshape(1, -1)
        packed.append((w_p, b_p))
    return packed


# ---------------------------------------------------------------------------
# Forward wrapper
# ---------------------------------------------------------------------------
def audio_ann_classifier(x, packed_params, *, tile_b=None):
    """Forward pass of AudioANNClassifier.

    x:             [B, in_features] float32.
    packed_params: output of `pack_params` (bf16 weights, f32 [1, out] biases).
    """
    B, in_features = x.shape
    dims = [in_features] + [w.shape[1] for w, _ in packed_params]
    out_features = dims[-1]

    if tile_b is None:
        tile_b = _choose_tile_b(B)
    tile_b = _round_up(tile_b, 8)

    b_pad = _round_up(B, tile_b)
    grid = b_pad // tile_b

    # Only pad batch rows (ragged batch); feature dims stay untouched.
    x_p = x if b_pad == B else jnp.pad(x, ((0, b_pad - B), (0, 0)))

    # x tile: (tile_b, in_features); in_features == full dim -> legal.
    in_specs = [pl.BlockSpec((tile_b, in_features), lambda i: (i, 0))]
    flat_params = []
    for w, b in packed_params:
        flat_params.extend([w, b])
        # Whole-array blocks, constant index maps: ~0.21 MB bf16 weight set
        # stays VMEM-resident across grid steps (no per-step re-DMA).
        in_specs.append(pl.BlockSpec(w.shape, lambda i: (0, 0)))
        in_specs.append(pl.BlockSpec(b.shape, lambda i: (0, 0)))

    # Output block is only out_features wide (== full dim): 16x less HBM
    # writeback than a 128-padded output, and no wrapper slice pass.
    out_spec = pl.BlockSpec((tile_b, out_features), lambda i: (i, 0))

    flops = 2 * b_pad * sum(dims[i] * dims[i + 1] for i in range(len(dims) - 1))
    weight_bytes = sum(w.size * w.dtype.itemsize + b.size * b.dtype.itemsize
                       for w, b in packed_params)
    bytes_accessed = (x_p.size * x_p.dtype.itemsize
                      + b_pad * out_features * 4
                      + weight_bytes)

    out_padded = pl.pallas_call(
        _mlp_kernel,
        out_shape=jax.ShapeDtypeStruct((b_pad, out_features), x.dtype),
        grid_spec=pltpu.PrefetchScalarGridSpec(
            num_scalar_prefetch=0,
            grid=(grid,),
            in_specs=in_specs,
            out_specs=out_spec,
        ),
        compiler_params=pltpu.CompilerParams(
            dimension_semantics=("parallel",),
            # tile_b<=2048: double-buffered x (2*2048*64*4 = 1 MiB) + out
            # tiles + ~6 MiB of f32 intermediates + <1 MiB weights -> well
            # under 32 MiB scoped and v7x's 64 MiB physical VMEM.
            vmem_limit_bytes=32 * 1024 * 1024,
        ),
        cost_estimate=pl.CostEstimate(
            flops=flops, transcendentals=0, bytes_accessed=bytes_accessed),
    )(x_p, *flat_params)

    # TODO(synk): for a serving loop of many tiny-batch calls, keep the <1 MB
    # weight set VMEM-resident across pallas_calls (P10 cross-call prefetch)
    # instead of re-staging it every invocation.
    return out_padded if b_pad == B else out_padded[:B]


# ---------------------------------------------------------------------------
# Init + reference
# ---------------------------------------------------------------------------
def init_params(key, in_features, out_features):
    """Deterministic init matching the PyTorch module's layer shapes."""
    sizes = [in_features, 256, 256, 128, 64, out_features]
    params = []
    for i in range(5):
        key, kw, kb = jax.random.split(key, 3)
        fan_in, fan_out = sizes[i], sizes[i + 1]
        bound = 1.0 / jnp.sqrt(fan_in)
        # stored as [in, out] (transpose of PyTorch's [out, in])
        w = jax.random.uniform(kw, (fan_in, fan_out), jnp.float32,
                               minval=-bound, maxval=bound)
        b = jax.random.uniform(kb, (1, fan_out), jnp.float32,
                               minval=-bound, maxval=bound)
        params.append((w, b))
    return params


def reference_mlp(x, params, weight_dtype=jnp.bfloat16):
    """Pure-JAX reference with the same mixed precision as the kernel."""
    h = x
    n = len(params)
    for i, (w, b) in enumerate(params):
        h = jnp.dot(h.astype(weight_dtype), w.astype(weight_dtype),
                    preferred_element_type=jnp.float32) + b.reshape(1, -1)
        if i < n - 1:
            h = jnp.maximum(h, 0.0)
    return h


# ---------------------------------------------------------------------------
# Demo / test
# ---------------------------------------------------------------------------
if __name__ == "__main__":
    key = jax.random.PRNGKey(0)
    in_features = 64
    out_features = 8
    batch = 8

    key, kx = jax.random.split(key)
    x = jax.random.normal(kx, (batch, in_features), jnp.float32)
    params = init_params(key, in_features, out_features)
    packed = pack_params(params)          # one-time weight pre-pack

    # small-batch path (single tile)
    out = jax.block_until_ready(audio_ann_classifier(x, packed))
    ref = reference_mlp(x, params)
    assert out.shape == (batch, out_features)
    assert jnp.allclose(out, ref, atol=1e-3, rtol=1e-3), "mismatch vs reference"

    # larger, ragged batch with a forced multi-step grid (batch padding +
    # >=2 pipelined steps path).
    key, kx2 = jax.random.split(key)
    x_big = jax.random.normal(kx2, (300, in_features), jnp.float32)
    out_big = jax.block_until_ready(
        audio_ann_classifier(x_big, packed, tile_b=128))
    ref_big = reference_mlp(x_big, params)
    assert out_big.shape == (300, out_features)
    assert jnp.allclose(out_big, ref_big, atol=1e-3, rtol=1e-3), "mismatch (big)"

    print("KERNEL_OK")
</pallas_src>

<mosaic_0001>
module attributes {stable_mosaic.version = 11 : i64} {
  func.func @_mlp_kernel(%arg0: i32, %arg1: memref<8x64xf32, #tpu.memory_space<vmem>>, %arg2: memref<64x256xbf16, #tpu.memory_space<vmem>>, %arg3: memref<1x256xf32, #tpu.memory_space<vmem>>, %arg4: memref<256x256xbf16, #tpu.memory_space<vmem>>, %arg5: memref<1x256xf32, #tpu.memory_space<vmem>>, %arg6: memref<256x128xbf16, #tpu.memory_space<vmem>>, %arg7: memref<1x128xf32, #tpu.memory_space<vmem>>, %arg8: memref<128x64xbf16, #tpu.memory_space<vmem>>, %arg9: memref<1x64xf32, #tpu.memory_space<vmem>>, %arg10: memref<64x8xbf16, #tpu.memory_space<vmem>>, %arg11: memref<1x8xf32, #tpu.memory_space<vmem>>, %arg12: memref<8x8xf32, #tpu.memory_space<vmem>>) attributes {dimension_semantics = [#tpu.dimension_semantics<parallel>], iteration_bounds = array<i64: 1>, scalar_prefetch = 0 : i64, scratch_operands = 0 : i64, tpu.core_type = #tpu.core_type<tc>, window_params = [{transform_indices = @transform_0, window_bounds = array<i64: 8, 64>}, {pipeline_mode = #tpu.pipeline_mode<synchronous>, transform_indices = @transform_1, window_bounds = array<i64: 64, 256>}, {pipeline_mode = #tpu.pipeline_mode<synchronous>, transform_indices = @transform_2, window_bounds = array<i64: 1, 256>}, {pipeline_mode = #tpu.pipeline_mode<synchronous>, transform_indices = @transform_3, window_bounds = array<i64: 256, 256>}, {pipeline_mode = #tpu.pipeline_mode<synchronous>, transform_indices = @transform_4, window_bounds = array<i64: 1, 256>}, {pipeline_mode = #tpu.pipeline_mode<synchronous>, transform_indices = @transform_5, window_bounds = array<i64: 256, 128>}, {pipeline_mode = #tpu.pipeline_mode<synchronous>, transform_indices = @transform_6, window_bounds = array<i64: 1, 128>}, {pipeline_mode = #tpu.pipeline_mode<synchronous>, transform_indices = @transform_7, window_bounds = array<i64: 128, 64>}, {pipeline_mode = #tpu.pipeline_mode<synchronous>, transform_indices = @transform_8, window_bounds = array<i64: 1, 64>}, {pipeline_mode = #tpu.pipeline_mode<synchronous>, transform_indices = @transform_9, window_bounds = array<i64: 64, 8>}, {pipeline_mode = #tpu.pipeline_mode<synchronous>, transform_indices = @transform_10, window_bounds = array<i64: 1, 8>}, {transform_indices = @transform_11, window_bounds = array<i64: 8, 8>}]} {
    %c0 = arith.constant 0 : index
    %c0_0 = arith.constant 0 : index
    %0 = vector.load %arg1[%c0, %c0_0] : memref<8x64xf32, #tpu.memory_space<vmem>>, vector<8x64xf32>
    %1 = arith.truncf %0 : vector<8x64xf32> to vector<8x64xbf16>
    %c0_1 = arith.constant 0 : index
    %c0_2 = arith.constant 0 : index
    %2 = vector.load %arg2[%c0_1, %c0_2] : memref<64x256xbf16, #tpu.memory_space<vmem>>, vector<64x256xbf16>
    %cst = arith.constant dense<0.000000e+00> : vector<8x256xf32>
    %3 = tpu.matmul %1, %2, %cst {dimension_numbers = #tpu.dot_dimension_numbers<[1], [0], [0], [1], [0, 0, 1, 1], [], []>} : vector<8x64xbf16>, vector<64x256xbf16>, vector<8x256xf32> -> vector<8x256xf32>
    %c0_3 = arith.constant 0 : index
    %c0_4 = arith.constant 0 : index
    %4 = vector.load %arg3[%c0_3, %c0_4] : memref<1x256xf32, #tpu.memory_space<vmem>>, vector<1x256xf32>
    %5 = vector.broadcast %4 : vector<1x256xf32> to vector<8x256xf32>
    %6 = arith.addf %3, %5 : vector<8x256xf32>
    %cst_5 = arith.constant 0.000000e+00 : f32
    %7 = vector.broadcast %cst_5 : f32 to vector<8x256xf32>
    %8 = arith.maximumf %6, %7 : vector<8x256xf32>
    %9 = arith.truncf %8 : vector<8x256xf32> to vector<8x256xbf16>
    %c0_6 = arith.constant 0 : index
    %c0_7 = arith.constant 0 : index
    %10 = vector.load %arg4[%c0_6, %c0_7] : memref<256x256xbf16, #tpu.memory_space<vmem>>, vector<256x256xbf16>
    %cst_8 = arith.constant dense<0.000000e+00> : vector<8x256xf32>
    %11 = tpu.matmul %9, %10, %cst_8 {dimension_numbers = #tpu.dot_dimension_numbers<[1], [0], [0], [1], [0, 0, 1, 1], [], []>} : vector<8x256xbf16>, vector<256x256xbf16>, vector<8x256xf32> -> vector<8x256xf32>
    %c0_9 = arith.constant 0 : index
    %c0_10 = arith.constant 0 : index
    %12 = vector.load %arg5[%c0_9, %c0_10] : memref<1x256xf32, #tpu.memory_space<vmem>>, vector<1x256xf32>
    %13 = vector.broadcast %12 : vector<1x256xf32> to vector<8x256xf32>
    %14 = arith.addf %11, %13 : vector<8x256xf32>
    %cst_11 = arith.constant 0.000000e+00 : f32
    %15 = vector.broadcast %cst_11 : f32 to vector<8x256xf32>
    %16 = arith.maximumf %14, %15 : vector<8x256xf32>
    %17 = arith.truncf %16 : vector<8x256xf32> to vector<8x256xbf16>
    %c0_12 = arith.constant 0 : index
    %c0_13 = arith.constant 0 : index
    %18 = vector.load %arg6[%c0_12, %c0_13] : memref<256x128xbf16, #tpu.memory_space<vmem>>, vector<256x128xbf16>
    %cst_14 = arith.constant dense<0.000000e+00> : vector<8x128xf32>
    %19 = tpu.matmul %17, %18, %cst_14 {dimension_numbers = #tpu.dot_dimension_numbers<[1], [0], [0], [1], [0, 0, 1, 1], [], []>} : vector<8x256xbf16>, vector<256x128xbf16>, vector<8x128xf32> -> vector<8x128xf32>
    %c0_15 = arith.constant 0 : index
    %c0_16 = arith.constant 0 : index
    %20 = vector.load %arg7[%c0_15, %c0_16] : memref<1x128xf32, #tpu.memory_space<vmem>>, vector<1x128xf32>
    %21 = vector.broadcast %20 : vector<1x128xf32> to vector<8x128xf32>
    %22 = arith.addf %19, %21 : vector<8x128xf32>
    %cst_17 = arith.constant 0.000000e+00 : f32
    %23 = vector.broadcast %cst_17 : f32 to vector<8x128xf32>
    %24 = arith.maximumf %22, %23 : vector<8x128xf32>
    %25 = arith.truncf %24 : vector<8x128xf32> to vector<8x128xbf16>
    %c0_18 = arith.constant 0 : index
    %c0_19 = arith.constant 0 : index
    %26 = vector.load %arg8[%c0_18, %c0_19] : memref<128x64xbf16, #tpu.memory_space<vmem>>, vector<128x64xbf16>
    %cst_20 = arith.constant dense<0.000000e+00> : vector<8x64xf32>
    %27 = tpu.matmul %25, %26, %cst_20 {dimension_numbers = #tpu.dot_dimension_numbers<[1], [0], [0], [1], [0, 0, 1, 1], [], []>} : vector<8x128xbf16>, vector<128x64xbf16>, vector<8x64xf32> -> vector<8x64xf32>
    %c0_21 = arith.constant 0 : index
    %c0_22 = arith.constant 0 : index
    %28 = vector.load %arg9[%c0_21, %c0_22] : memref<1x64xf32, #tpu.memory_space<vmem>>, vector<1x64xf32>
    %29 = vector.broadcast %28 : vector<1x64xf32> to vector<8x64xf32>
    %30 = arith.addf %27, %29 : vector<8x64xf32>
    %cst_23 = arith.constant 0.000000e+00 : f32
    %31 = vector.broadcast %cst_23 : f32 to vector<8x64xf32>
    %32 = arith.maximumf %30, %31 : vector<8x64xf32>
    %33 = arith.truncf %32 : vector<8x64xf32> to vector<8x64xbf16>
    %c0_24 = arith.constant 0 : index
    %c0_25 = arith.constant 0 : index
    %34 = vector.load %arg10[%c0_24, %c0_25] : memref<64x8xbf16, #tpu.memory_space<vmem>>, vector<64x8xbf16>
    %cst_26 = arith.constant dense<0.000000e+00> : vector<8x8xf32>
    %35 = tpu.matmul %33, %34, %cst_26 {dimension_numbers = #tpu.dot_dimension_numbers<[1], [0], [0], [1], [0, 0, 1, 1], [], []>} : vector<8x64xbf16>, vector<64x8xbf16>, vector<8x8xf32> -> vector<8x8xf32>
    %c0_27 = arith.constant 0 : index
    %c0_28 = arith.constant 0 : index
    %36 = vector.load %arg11[%c0_27, %c0_28] : memref<1x8xf32, #tpu.memory_space<vmem>>, vector<1x8xf32>
    %37 = vector.broadcast %36 : vector<1x8xf32> to vector<8x8xf32>
    %38 = arith.addf %35, %37 : vector<8x8xf32>
    %c0_29 = arith.constant 0 : index
    %c0_30 = arith.constant 0 : index
    %39 = vector.load %arg12[%c0_29, %c0_30] : memref<8x8xf32, #tpu.memory_space<vmem>>, vector<8x8xf32>
    tpu.vector_store %arg12[%c0_29, %c0_30], %38 {strides = array<i32>} : memref<8x8xf32, #tpu.memory_space<vmem>>, vector<8x8xf32>,
    return
  }
  func.func @transform_0(%arg0: i32) -> (i32, i32) {
    %c0_i32 = arith.constant 0 : i32
    %c0_i32_0 = arith.constant 0 : i32
    return %arg0, %c0_i32 : i32, i32
  }
  func.func @transform_1(%arg0: i32) -> (i32, i32) {
    %c0_i32 = arith.constant 0 : i32
    %c0_i32_0 = arith.constant 0 : i32
    %c0_i32_1 = arith.constant 0 : i32
    return %c0_i32, %c0_i32_0 : i32, i32
  }
  func.func @transform_2(%arg0: i32) -> (i32, i32) {
    %c0_i32 = arith.constant 0 : i32
    %c0_i32_0 = arith.constant 0 : i32
    %c0_i32_1 = arith.constant 0 : i32
    return %c0_i32, %c0_i32_0 : i32, i32
  }
  func.func @transform_3(%arg0: i32) -> (i32, i32) {
    %c0_i32 = arith.constant 0 : i32
    %c0_i32_0 = arith.constant 0 : i32
    %c0_i32_1 = arith.constant 0 : i32
    return %c0_i32, %c0_i32_0 : i32, i32
  }
  func.func @transform_4(%arg0: i32) -> (i32, i32) {
    %c0_i32 = arith.constant 0 : i32
    %c0_i32_0 = arith.constant 0 : i32
    %c0_i32_1 = arith.constant 0 : i32
    return %c0_i32, %c0_i32_0 : i32, i32
  }
  func.func @transform_5(%arg0: i32) -> (i32, i32) {
    %c0_i32 = arith.constant 0 : i32
    %c0_i32_0 = arith.constant 0 : i32
    %c0_i32_1 = arith.constant 0 : i32
    return %c0_i32, %c0_i32_0 : i32, i32
  }
  func.func @transform_6(%arg0: i32) -> (i32, i32) {
    %c0_i32 = arith.constant 0 : i32
    %c0_i32_0 = arith.constant 0 : i32
    %c0_i32_1 = arith.constant 0 : i32
    return %c0_i32, %c0_i32_0 : i32, i32
  }
  func.func @transform_7(%arg0: i32) -> (i32, i32) {
    %c0_i32 = arith.constant 0 : i32
    %c0_i32_0 = arith.constant 0 : i32
    %c0_i32_1 = arith.constant 0 : i32
    return %c0_i32, %c0_i32_0 : i32, i32
  }
  func.func @transform_8(%arg0: i32) -> (i32, i32) {
    %c0_i32 = arith.constant 0 : i32
    %c0_i32_0 = arith.constant 0 : i32
    %c0_i32_1 = arith.constant 0 : i32
    return %c0_i32, %c0_i32_0 : i32, i32
  }
  func.func @transform_9(%arg0: i32) -> (i32, i32) {
    %c0_i32 = arith.constant 0 : i32
    %c0_i32_0 = arith.constant 0 : i32
    %c0_i32_1 = arith.constant 0 : i32
    return %c0_i32, %c0_i32_0 : i32, i32
  }
  func.func @transform_10(%arg0: i32) -> (i32, i32) {
    %c0_i32 = arith.constant 0 : i32
    %c0_i32_0 = arith.constant 0 : i32
    %c0_i32_1 = arith.constant 0 : i32
    return %c0_i32, %c0_i32_0 : i32, i32
  }
  func.func @transform_11(%arg0: i32) -> (i32, i32) {
    %c0_i32 = arith.constant 0 : i32
    %c0_i32_0 = arith.constant 0 : i32
    return %arg0, %c0_i32 : i32, i32
  }
}

</mosaic_0001>

<bundles_post_ra>
// kernel: tpu_custom_call.1
= control target key start
LH: loop header
LB: loop body
LE: loop exit
PB: predicated region body
PF: predicated region fallthrough
CT: control target
= control target key end

     0   :  { %16 = vsyncpa [#allocation3], 0  ;;  %s1503_s0 = inlined_call_operand.vmem [shape: f32[8,64], index: 0, kind: input, shape index: {}]   ;;  %s1504_s1 = inlined_call_operand.hbm [shape: bf16[64,256], index: 1, kind: input, shape index: {}]   ;;  %s1505_s2 = inlined_call_operand.hbm [shape: f32[1,256], index: 2, kind: input, shape index: {}]   ;;  %s1506_s3 = inlined_call_operand.hbm [shape: bf16[256,256], index: 3, kind: input, shape index: {}]   ;;  %s1507_s4 = inlined_call_operand.hbm [shape: f32[1,256], index: 4, kind: input, shape index: {}]   ;;  %s1508_s5 = inlined_call_operand.vmem [shape: bf16[256,128], index: 5, kind: input, shape index: {}]   ;;  %s1509_s6 = inlined_call_operand.hbm [shape: f32[1,128], index: 6, kind: input, shape index: {}]   ;;  %s1510_s7 = inlined_call_operand.vmem [shape: bf16[128,64], index: 7, kind: input, shape index: {}]   ;;  %s1511_s8 = inlined_call_operand.hbm [shape: f32[1,64], index: 8, kind: input, shape index: {}]   ;;  %s1512_s9 = inlined_call_operand.vmem [shape: bf16[64,8], index: 9, kind: input, shape index: {}]   ;;  %s1513_s10 = inlined_call_operand.vmem [shape: f32[1,8], index: 10, kind: input, shape index: {}]   ;;  %s1514_s11 = inlined_call_operand.hbm [shape: f32[8,8], index: 11, kind: output, shape index: {}]  }
   0x1   :  { %17 = vsyncpa [#allocation6], 0 }
   0x2   :  { %18 = vsyncpa [#allocation9], 0 }
   0x3   :  { %19 = vsyncpa [#allocation12], 0  ;;  %s41_s19 = sshll.u32 %s1505_s2, 4  ;;  %s42_s19 = int_to_ptr.hbm [resolvable:$true] %s41_s19 }
   0x4   :  { %20 = vsyncpa [#allocation4], 0  ;;  %s1320_s20 = smov [#allocation5]   ;;  %s65_s24 = sshll.u32 %s1507_s4, 4  ;;  %s66_s24 = int_to_ptr.hbm [resolvable:$true] %s65_s24 }
   0x5   :  { %s43_s21 = sshll.u32 %s1320_s20, 4  ;;  %s1321_s25 = smov [#allocation8]   ;;  %s44_s21 = int_to_ptr.vmem [resolvable:$true] %s43_s21 }
   0x6   :  { %46 = dma.hbm_to_vmem [thread:$0]  %s42_s19, 32, %s44_s21, [#allocation6]  }
   0x7   :  { %s67_s26 = sshll.u32 %s1321_s25, 4  ;;  %s27_s29 = sshll.u32 %s1504_s1, 4  ;;  %s68_s26 = int_to_ptr.vmem [resolvable:$true] %s67_s26  ;;  %s28_s29 = int_to_ptr.hbm [resolvable:$true] %s27_s29 }
   0x8   :  { %70 = dma.hbm_to_vmem [thread:$0]  %s66_s24, 32, %s68_s26, [#allocation9]  }
   0x9   :  { %s1322_s2 = smov [#allocation2]   ;;  %s51_s14 = sshll.u32 %s1506_s3, 4  ;;  %s52_s14 = int_to_ptr.hbm [resolvable:$true] %s51_s14 }
   0xa   :  { %s29_s30 = sshll.u32 %s1322_s2, 4  ;;  %s1323_s15 = smov 128   ;;  %s30_s30 = int_to_ptr.vmem [resolvable:$true] %s29_s30 }
   0xb   :  { %s1324_s4 = smov 8   ;;  %s1325_s16 = smov [#allocation7]  }
   0xc   :  { %35 = dma.hbm_to_vmem [thread:$0]  %s28_s29, 1024, %s30_s30, [#allocation3], %s1323_s15, %s1323_s15, %s1324_s4  }
   0xd   :  { %s53_s17 = sshll.u32 %s1325_s16, 4  ;;  %s78_s1 = sshll.u32 %s1509_s6, 4  ;;  %s54_s17 = int_to_ptr.vmem [resolvable:$true] %s53_s17  ;;  %s79_s1 = int_to_ptr.hbm [resolvable:$true] %s78_s1 }
   0xe   :  { %59 = dma.hbm_to_vmem [thread:$0]  %s52_s14, 4096, %s54_s17, [#allocation6], %s1323_s15, %s1323_s15, %s1324_s4  }
   0xf   :  { %s91_s22 = sshll.u32 %s1511_s8, 4  ;;  %s1326_s23 = smov [#allocation10]   ;;  %s92_s22 = int_to_ptr.hbm [resolvable:$true] %s91_s22 }
  0x10   :  { %s80_s24 = sshll.u32 %s1326_s23, 4  ;;  %s1327_s3 = smov [#allocation11]   ;;  %s81_s24 = int_to_ptr.vmem [resolvable:$true] %s80_s24 }
  0x11   :  { %83 = dma.hbm_to_vmem [thread:$0]  %s79_s1, 16, %s81_s24, [#allocation9]  }
  0x12   :  { %s93_s25 = sshll.u32 %s1327_s3, 4  ;;  %s94_s25 = int_to_ptr.vmem [resolvable:$true] %s93_s25 }
  0x13   :  { %96 = dma.hbm_to_vmem [thread:$0]  %s92_s22, 16, %s94_s25, [#allocation12]  }
  0x14   :  { %1310 = dma.done.wait [#allocation3], 1024  }
  0x15   :  { %1311 = vsyncadd [#allocation3], 4294966272 }
  0x16   :  { %1312 = dma.done.wait [#allocation6], 4128  }
  0x17   :  { %1313 = vsyncadd [#allocation6], 4294963168 }
  0x18   :  { %1314 = dma.done.wait [#allocation9], 48  }
  0x19   :  { %1315 = vsyncadd [#allocation9], 4294967248 }
  0x1a   :  { %1316 = dma.done.wait [#allocation12], 16  }
  0x1b   :  { %1317 = vsyncadd [#allocation12], 4294967280  ;;  %v813_v0 = vld [vmem:[#allocation2 + $0x30] sm:$0xf]  ;;  %v1069_v1 = vld [vmem:[#allocation2 + $0x34] sm:$0xf0] }
  0x1c   :  { %v1068_v2 = vld [vmem:[#allocation2 + $0x34] sm:$0xf]  ;;  %v814_v3 = vor.u32 %v1069_v1, %v813_v0  ;;  %v815_v4 = vld [vmem:[#allocation2 + $0x38] sm:$0xf0]  ;;  %v805_v5 = vld [vmem:[#allocation2 + $0x20] sm:$0xf] }
  0x1d   :  { %v1067_v6 = vld [vmem:[#allocation2 + $0x24] sm:$0xf0]  ;;  %v818_v7 = vor.u32 %v1068_v2, %v815_v4  ;;  %v1066_v8 = vld [vmem:[#allocation2 + $0x24] sm:$0xf]  ;;  %v807_v9 = vld [vmem:[#allocation2 + $0x28] sm:$0xf0] }
  0x1e   :  { %190 = vmatpush.bf16.msra.mxu0 %v814_v3  ;;  %v806_v10 = vor.u32 %v1067_v6, %v805_v5  ;;  %v810_v11 = vor.u32 %v1066_v8, %v807_v9  ;;  %v797_v12 = vld [vmem:[#allocation2 + $0x10] sm:$0xf]  ;;  %v1065_v13 = vld [vmem:[#allocation2 + $0x14] sm:$0xf0]  ;;  %v1064_v14 = vld [vmem:[#allocation2 + $0x14] sm:$0xf] }
  0x1f   :  { %203 = vmatpush.bf16.msra.mxu1 %v818_v7  ;;  %v799_v15 = vld [vmem:[#allocation2 + $0x18] sm:$0xf0]  ;;  %v879_v16 = vld [vmem:[#allocation7 + $0x70] sm:$0xf]  ;;  %v789_v17 = vld [vmem:[#allocation2] sm:$0xf]  ;;  %v798_v21 = vor.u32 %v1065_v13, %v797_v12 }
  0x20   :  { %v1085_v18 = vld [vmem:[#allocation7 + $0x74] sm:$0xf0]  ;;  %v943_v19 = vld [vmem:[#allocation7 + $0xf0] sm:$0xf]  ;;  %v1063_v22 = vld [vmem:[#allocation2 + $0x4] sm:$0xf0]  ;;  %v802_v27 = vor.u32 %v1064_v14, %v799_v15 }
  0x21   :  { %v1101_v20 = vld [vmem:[#allocation7 + $0xf4] sm:$0xf0]  ;;  %v1062_v23 = vld [vmem:[#allocation2 + $0x4] sm:$0xf]  ;;  %v791_v24 = vld [vmem:[#allocation2 + $0x8] sm:$0xf0]  ;;  %v880_v25 = vor.u32 %v1085_v18, %v879_v16  ;;  %v790_v39 = vor.u32 %v1063_v22, %v789_v17 }
  0x22   :  { %191 = vmatpush.bf16.msra.mxu0 %v806_v10  ;;  %v944_v26 = vor.u32 %v1101_v20, %v943_v19  ;;  %v1084_v28 = vld [vmem:[#allocation7 + $0x74] sm:$0xf]  ;;  %v871_v29 = vld [vmem:[#allocation7 + $0x60] sm:$0xf]  ;;  %v1083_v30 = vld [vmem:[#allocation7 + $0x64] sm:$0xf0]  ;;  %v794_v43 = vor.u32 %v1062_v23, %v791_v24 }
  0x23   :  { %204 = vmatpush.bf16.msra.mxu1 %v810_v11  ;;  %414 = vmatpush.bf16.msra.mxu2 %v880_v25  ;;  %v881_v31 = vld [vmem:[#allocation7 + $0x78] sm:$0xf0]  ;;  %v872_v32 = vor.u32 %v1083_v30, %v871_v29  ;;  %v935_v33 = vld [vmem:[#allocation7 + $0xe0] sm:$0xf]  ;;  %v1099_v34 = vld [vmem:[#allocation7 + $0xe4] sm:$0xf0] }
  0x24   :  { %427 = vmatpush.bf16.msra.mxu3 %v944_v26  ;;  %v126_v35 = vld [vmem:[%s1503_s0] sm:$0xff]  ;;  %v1100_v36 = vld [vmem:[#allocation7 + $0xf4] sm:$0xf]  ;;  %v936_v38 = vor.u32 %v1099_v34, %v935_v33  ;;  %v863_v40 = vld [vmem:[#allocation7 + $0x50] sm:$0xf]  ;;  %v884_v44 = vor.u32 %v1084_v28, %v881_v31  ;;  %vm182_vm0 = vcmask 523264  }
  0x25   :  { %v945_v37 = vld [vmem:[#allocation7 + $0xf8] sm:$0xf0]  ;;  %v1081_v41 = vld [vmem:[#allocation7 + $0x54] sm:$0xf0]  ;;  %v927_v42 = vld [vmem:[#allocation7 + $0xd0] sm:$0xf]  ;;  %v127_v51 = vpack.c.bf16 %v126_v35, %v126_v35 }
  0x26   :  { %192 = vmatpush.bf16.msra.mxu0 %v798_v21  ;;  %v1097_v45 = vld [vmem:[#allocation7 + $0xd4] sm:$0xf0]  ;;  %v948_v46 = vor.u32 %v1100_v36, %v945_v37  ;;  %v1082_v47 = vld [vmem:[#allocation7 + $0x64] sm:$0xf]  ;;  %v873_v48 = vld [vmem:[#allocation7 + $0x68] sm:$0xf0]  ;;  %v864_v50 = vor.u32 %v1081_v41, %v863_v40 }
  0x27   :  { %205 = vmatpush.bf16.msra.mxu1 %v802_v27  ;;  %415 = vmatpush.bf16.msra.mxu2 %v872_v32  ;;  %v1098_v49 = vld [vmem:[#allocation7 + $0xe4] sm:$0xf]  ;;  %v937_v52 = vld [vmem:[#allocation7 + $0xe8] sm:$0xf0]  ;;  %v928_v53 = vor.u32 %v1097_v45, %v927_v42  ;;  %v855_v54 = vld [vmem:[#allocation7 + $0x40] sm:$0xf]  ;;  %v876_v58 = vor.u32 %v1082_v47, %v873_v48 }
  0x28   :  { %428 = vmatpush.bf16.msra.mxu3 %v936_v38  ;;  %v1079_v55 = vld [vmem:[#allocation7 + $0x44] sm:$0xf0]  ;;  %v919_v56 = vld [vmem:[#allocation7 + $0xc0] sm:$0xf]  ;;  %v940_v59 = vor.u32 %v1098_v49, %v937_v52  ;;  %v1080_v60 = vld [vmem:[#allocation7 + $0x54] sm:$0xf] }
  0x29   :  { %v1095_v57 = vld [vmem:[#allocation7 + $0xc4] sm:$0xf0]  ;;  %v865_v61 = vld [vmem:[#allocation7 + $0x58] sm:$0xf0]  ;;  %v1096_v62 = vld [vmem:[#allocation7 + $0xd4] sm:$0xf]  ;;  %v856_v63 = vor.u32 %v1079_v55, %v855_v54 }
  0x2a   :  { %193 = vmatpush.bf16.msra.mxu0 %v790_v39  ;;  %v929_v0 = vld [vmem:[#allocation7 + $0xd8] sm:$0xf0]  ;;  %v920_v1 = vor.u32 %v1095_v57, %v919_v56  ;;  %v847_v2 = vld [vmem:[#allocation7 + $0x30] sm:$0xf]  ;;  %v1077_v3 = vld [vmem:[#allocation7 + $0x34] sm:$0xf0]  ;;  %v868_v6 = vor.u32 %v1080_v60, %v865_v61 }
  0x2b   :  { %206 = vmatpush.bf16.msra.mxu1 %v794_v43  ;;  %416 = vmatpush.bf16.msra.mxu2 %v864_v50  ;;  %v911_v4 = vld [vmem:[#allocation7 + $0xb0] sm:$0xf]  ;;  %v1093_v5 = vld [vmem:[#allocation7 + $0xb4] sm:$0xf0]  ;;  %v1078_v7 = vld [vmem:[#allocation7 + $0x44] sm:$0xf]  ;;  %v932_v9 = vor.u32 %v1096_v62, %v929_v0  ;;  %v848_v12 = vor.u32 %v1077_v3, %v847_v2 }
  0x2c   :  { %429 = vmatpush.bf16.msra.mxu3 %v928_v53  ;;  %v857_v8 = vld [vmem:[#allocation7 + $0x48] sm:$0xf0]  ;;  %v1094_v10 = vld [vmem:[#allocation7 + $0xc4] sm:$0xf]  ;;  %v839_v13 = vld [vmem:[#allocation7 + $0x20] sm:$0xf]  ;;  %v912_v14 = vor.u32 %v1093_v5, %v911_v4 }
  0x2d   :  { %819 = vmatmul.msk.bf16.vlgmr.msra.gmra.mxu0 %vm182_vm0, %v127_v51  ;;  %v921_v11 = vld [vmem:[#allocation7 + $0xc8] sm:$0xf0]  ;;  %v1075_v15 = vld [vmem:[#allocation7 + $0x24] sm:$0xf0]  ;;  %v903_v16 = vld [vmem:[#allocation7 + $0xa0] sm:$0xf]  ;;  %v860_v18 = vor.u32 %v1078_v7, %v857_v8 }
  0x2e   :  { %440 = vmatpush.bf16.msrb.mxu0 %v884_v44  ;;  %820 = vmatmul.msk.bf16.vlgmr.msra.gmra.mxu1 %vm182_vm0, %v127_v51  ;;  %v1091_v17 = vld [vmem:[#allocation7 + $0xa4] sm:$0xf0]  ;;  %v924_v19 = vor.u32 %v1094_v10, %v921_v11  ;;  %v1076_v20 = vld [vmem:[#allocation7 + $0x34] sm:$0xf]  ;;  %v849_v21 = vld [vmem:[#allocation7 + $0x38] sm:$0xf0]  ;;  %v840_v22 = vor.u32 %v1075_v15, %v839_v13 }
  0x2f   :  { %453 = vmatpush.bf16.msrb.mxu1 %v948_v46  ;;  %417 = vmatpush.bf16.msra.mxu2 %v856_v63  ;;  %v1092_v23 = vld [vmem:[#allocation7 + $0xb4] sm:$0xf]  ;;  %v913_v24 = vld [vmem:[#allocation7 + $0xb8] sm:$0xf0]  ;;  %v904_v25 = vor.u32 %v1091_v17, %v903_v16  ;;  %v852_v26 = vor.u32 %v1076_v20, %v849_v21  ;;  %v1074_v28 = vld [vmem:[#allocation7 + $0x24] sm:$0xf] }
  0x30   :  { %430 = vmatpush.bf16.msra.mxu3 %v920_v1  ;;  %v916_v27 = vor.u32 %v1092_v23, %v913_v24  ;;  %v841_v29 = vld [vmem:[#allocation7 + $0x28] sm:$0xf0]  ;;  %v1090_v30 = vld [vmem:[#allocation7 + $0xa4] sm:$0xf]  ;;  %v831_v34 = vld [vmem:[#allocation7 + $0x10] sm:$0xf] }
  0x31   :  { %v905_v31 = vld [vmem:[#allocation7 + $0xa8] sm:$0xf0]  ;;  %v844_v32 = vor.u32 %v1074_v28, %v841_v29  ;;  %v1073_v35 = vld [vmem:[#allocation7 + $0x14] sm:$0xf0]  ;;  %v895_v36 = vld [vmem:[#allocation7 + $0x90] sm:$0xf] }
  0x32   :  { %441 = vmatpush.bf16.msrb.mxu0 %v876_v58  ;;  %v908_v33 = vor.u32 %v1090_v30, %v905_v31  ;;  %v832_v37 = vor.u32 %v1073_v35, %v831_v34  ;;  %v1089_v38 = vld [vmem:[#allocation7 + $0x94] sm:$0xf0]  ;;  %v1072_v39 = vld [vmem:[#allocation7 + $0x14] sm:$0xf]  ;;  %v833_v40 = vld [vmem:[#allocation7 + $0x18] sm:$0xf0] }
  0x33   :  { %454 = vmatpush.bf16.msrb.mxu1 %v940_v59  ;;  %418 = vmatpush.bf16.msra.mxu2 %v848_v12  ;;  %v896_v41 = vor.u32 %v1089_v38, %v895_v36  ;;  %v836_v42 = vor.u32 %v1072_v39, %v833_v40  ;;  %v1088_v43 = vld [vmem:[#allocation7 + $0x94] sm:$0xf]  ;;  %v897_v44 = vld [vmem:[#allocation7 + $0x98] sm:$0xf0]  ;;  %v823_v46 = vld [vmem:[#allocation7] sm:$0xf] }
  0x34   :  { %431 = vmatpush.bf16.msra.mxu3 %v912_v14  ;;  %v900_v45 = vor.u32 %v1088_v43, %v897_v44  ;;  %v1071_v47 = vld [vmem:[#allocation7 + $0x4] sm:$0xf0]  ;;  %v887_v48 = vld [vmem:[#allocation7 + $0x80] sm:$0xf]  ;;  %v1070_v51 = vld [vmem:[#allocation7 + $0x4] sm:$0xf] }
  0x35   :  { %v824_v49 = vor.u32 %v1071_v47, %v823_v46  ;;  %v1087_v50 = vld [vmem:[#allocation7 + $0x84] sm:$0xf0]  ;;  %v825_v52 = vld [vmem:[#allocation7 + $0x8] sm:$0xf0]  ;;  %v1086_v55 = vld [vmem:[#allocation7 + $0x84] sm:$0xf] }
  0x36   :  { %442 = vmatpush.bf16.msrb.mxu0 %v868_v6  ;;  %v888_v53 = vor.u32 %v1087_v50, %v887_v48  ;;  %v828_v54 = vor.u32 %v1070_v51, %v825_v52  ;;  %v889_v56 = vld [vmem:[#allocation7 + $0x88] sm:$0xf0]  ;;  %v1117_v58 = vld [vmem:[%s1508_s5 + $0x78] sm:$0xff]  ;;  %v1114_v0 = vld [vmem:[%s1508_s5 + $0x60] sm:$0xff]  ;;  %s1328_s29 = smov [#allocation13]   ;;  %s774_s13 = sshll.u32 %s1514_s11, 4  ;;  %s775_s13 = int_to_ptr.hbm [resolvable:$true] %s774_s13 }
  0x37   :  { %455 = vmatpush.bf16.msrb.mxu1 %v932_v9  ;;  %419 = vmatpush.bf16.msra.mxu2 %v840_v22  ;;  %v892_v57 = vor.u32 %v1086_v55, %v889_v56  ;;  %v1109_v59 = vld [vmem:[%s1508_s5 + $0x38] sm:$0xff]  ;;  %v1116_v60 = vld [vmem:[%s1508_s5 + $0x70] sm:$0xff]  ;;  %v1115_v62 = vld [vmem:[%s1508_s5 + $0x68] sm:$0xff]  ;;  %s772_s2 = sshll.u32 %s1328_s29, 4  ;;  %vm765_vm1 = vcmask 64512   ;;  %s773_s2 = int_to_ptr.vmem [resolvable:$true] %s772_s2 }
  0x38   :  { %432 = vmatpush.bf16.msra.mxu3 %v904_v25  ;;  %v1108_v61 = vld [vmem:[%s1508_s5 + $0x30] sm:$0xff]  ;;  %v1107_v63 = vld [vmem:[%s1508_s5 + $0x28] sm:$0xff]  ;;  %v1106_v1 = vld [vmem:[%s1508_s5 + $0x20] sm:$0xff] }
  0x39   :  { %v1113_v2 = vld [vmem:[%s1508_s5 + $0x58] sm:$0xff]  ;;  %v136_v3 = vld [vmem:[#allocation5] sm:$0x3]  ;;  %v1112_v4 = vld [vmem:[%s1508_s5 + $0x50] sm:$0xff] }
  0x3a   :  { %443 = vmatpush.bf16.msrb.mxu0 %v860_v18  ;;  %v138_v5 = vperm.slane %v136_v3, 0  ;;  %v139_v6 = vperm.slane %v136_v3, 1  ;;  %v1105_v17 = vld [vmem:[%s1508_s5 + $0x18] sm:$0xff]  ;;  %v1111_v18 = vld [vmem:[%s1508_s5 + $0x48] sm:$0xff]  ;;  %v1110_v20 = vld [vmem:[%s1508_s5 + $0x40] sm:$0xff] }
  0x3b   :  { %456 = vmatpush.bf16.msrb.mxu1 %v924_v19  ;;  %420 = vmatpush.bf16.msra.mxu2 %v832_v37  ;;  %v1104_v19 = vld [vmem:[%s1508_s5 + $0x10] sm:$0xff]  ;;  %v1103_v21 = vld [vmem:[%s1508_s5 + $0x8] sm:$0xff]  ;;  %v1102_v22 = vld [vmem:[%s1508_s5] sm:$0xff] }
  0x3c   :  { %433 = vmatpush.bf16.msra.mxu3 %v896_v41  ;;  %v1125_v23 = vld [vmem:[%s1510_s7 + $0x38] sm:$0xff]  ;;  %v1124_v24 = vld [vmem:[%s1510_s7 + $0x30] sm:$0xff]  ;;  %v1123_v25 = vld [vmem:[%s1510_s7 + $0x28] sm:$0xff] }
  0x3d   :  { %v1121_v46 = vld [vmem:[%s1510_s7 + $0x18] sm:$0xff]  ;;  %v1120_v47 = vld [vmem:[%s1510_s7 + $0x10] sm:$0xff]  ;;  %v1119_v48 = vld [vmem:[%s1510_s7 + $0x8] sm:$0xff] }
  0x3e   :  { %444 = vmatpush.bf16.msrb.mxu0 %v852_v26  ;;  %v1122_v26 = vld [vmem:[%s1510_s7 + $0x20] sm:$0xff]  ;;  %v1129_v50 = vld [vmem:[%s1512_s9 + $0x18] sm:$0xff]  ;;  %v1128_v51 = vld [vmem:[%s1512_s9 + $0x10] sm:$0xff] }
  0x3f   :  { %457 = vmatpush.bf16.msrb.mxu1 %v916_v27  ;;  %421 = vmatpush.bf16.msra.mxu2 %v824_v49  ;;  %v248_v27 = vld [vmem:[#allocation8] sm:$0x3]  ;;  %v1127_v52 = vld [vmem:[%s1512_s9 + $0x8] sm:$0xff] }
  0x40   :  { %434 = vmatpush.bf16.msra.mxu3 %v888_v53  ;;  %v251_v28 = vperm.slane %v248_v27, 1  ;;  %v1118_v49 = vld [vmem:[%s1510_s7] sm:$0xff] }
  0x42   :  { %445 = vmatpush.bf16.msrb.mxu0 %v844_v32 }
  0x43   :  { %458 = vmatpush.bf16.msrb.mxu1 %v908_v33  ;;  %602 = vmatpush.bf16.msrb.mxu2 %v1109_v59  ;;  %v250_v33 = vperm.slane %v248_v27, 0 }
  0x44   :  { %615 = vmatpush.bf16.msrb.mxu3 %v1117_v58 }
  0x46   :  { %446 = vmatpush.bf16.msrb.mxu0 %v836_v42 }
  0x47   :  { %459 = vmatpush.bf16.msrb.mxu1 %v900_v45  ;;  %603 = vmatpush.bf16.msrb.mxu2 %v1108_v61 }
  0x48   :  { %616 = vmatpush.bf16.msrb.mxu3 %v1116_v60 }
  0x4a   :  { %447 = vmatpush.bf16.msrb.mxu0 %v828_v54  ;;  %v1139_v54 = vld [vmem:[#allocation10] ss:$0 sm:$0xff] }
  0x4b   :  { %460 = vmatpush.bf16.msrb.mxu1 %v892_v57  ;;  %604 = vmatpush.bf16.msrb.mxu2 %v1107_v63  ;;  %v1140_v63 = vld [vmem:[#allocation11] ss:$0 sm:$0xff] }
  0x4c   :  { %617 = vmatpush.bf16.msrb.mxu3 %v1115_v62  ;;  %v1126_v62 = vld [vmem:[%s1512_s9] sm:$0xff] }
  0x4e   :  { %698 = vmatpush.bf16.msra.mxu0 %v1125_v23 }
  0x4f   :  { %605 = vmatpush.bf16.msrb.mxu2 %v1106_v1  ;;  %756 = vmatpush.bf16.msra.mxu1 %v1129_v50 }
  0x50   :  { %618 = vmatpush.bf16.msrb.mxu3 %v1114_v0 }
  0x52   :  { %699 = vmatpush.bf16.msra.mxu0 %v1124_v24 }
  0x53   :  { %606 = vmatpush.bf16.msrb.mxu2 %v1105_v17  ;;  %757 = vmatpush.bf16.msra.mxu1 %v1128_v51 }
  0x54   :  { %619 = vmatpush.bf16.msrb.mxu3 %v1113_v2 }
  0x56   :  { %700 = vmatpush.bf16.msra.mxu0 %v1123_v25 }
  0x57   :  { %607 = vmatpush.bf16.msrb.mxu2 %v1104_v19  ;;  %758 = vmatpush.bf16.msra.mxu1 %v1127_v52 }
  0x58   :  { %620 = vmatpush.bf16.msrb.mxu3 %v1112_v4 }
  0x5a   :  { %701 = vmatpush.bf16.msra.mxu0 %v1122_v26 }
  0x5b   :  { %608 = vmatpush.bf16.msrb.mxu2 %v1103_v21  ;;  %759 = vmatpush.bf16.msra.mxu1 %v1126_v62 }
  0x5c   :  { %621 = vmatpush.bf16.msrb.mxu3 %v1111_v18 }
  0x5e   :  { %702 = vmatpush.bf16.msra.mxu0 %v1121_v46 }
  0x5f   :  { %609 = vmatpush.bf16.msrb.mxu2 %v1102_v22 }
  0x60   :  { %622 = vmatpush.bf16.msrb.mxu3 %v1110_v20 }
  0x62   :  { %703 = vmatpush.bf16.msra.mxu0 %v1120_v47 }
  0x66   :  { %704 = vmatpush.bf16.msra.mxu0 %v1119_v48 }
  0x6a   :  { %705 = vmatpush.bf16.msra.mxu0 %v1118_v49 }
  0xaa   :  { %v195_v7 = vpop.f32.mrf.mxu0 }
  0xab   :  { %v196_v8 = vadd.f32 %v195_v7, %v138_v5  ;;  %v208_v9 = vpop.f32.mrf.mxu1  ;;  %v1141_v5 = vld [vmem:[%s1513_s10] ss:$0 sm:$0xff] }
  0xac   :  { %v209_v10 = vadd.f32 %v208_v9, %v139_v6 }
  0xad   :  { %v212_v11 = vmax.f32 %v196_v8, 0.0 }
  0xae   :  { %v213_v12 = vmax.f32 %v209_v10, 0.0 }
  0xaf   :  { %v214_v13 = vpack.c.bf16 %v212_v11, %v212_v11 }
  0xb0   :  { %v215_v14 = vpack.c.bf16 %v213_v12, %v213_v12 }
  0xb1   :  { %422 = vmatmul.bf16.vlgmr.msra.gmra.mxu2 %v214_v13  ;;  %448 = vmatmul.bf16.vlgmr.msrb.gmra.mxu0 %v214_v13 }
  0xb2   :  { %435 = vmatmul.bf16.vlgmr.msra.gmra.mxu3 %v215_v14  ;;  %461 = vmatmul.bf16.vlgmr.msrb.gmra.mxu1 %v215_v14  ;;  %v197_v15 = vpop.f32.mrf.mxu0 }
  0xb3   :  { %v210_v16 = vpop.f32.mrf.mxu1 }
 0x12e   :  { %v449_v29 = vpop.f32.mrf.mxu0 }
 0x12f   :  { %v450_v30 = vadd.f32 %v449_v29, %v251_v28  ;;  %v462_v31 = vpop.f32.mrf.mxu1 }
 0x131   :  { %v463_v32 = vadd.f32 %v462_v31, %v450_v30 }
 0x133   :  { %v467_v34 = vmax.f32 %v463_v32, 0.0 }
 0x134   :  { %v423_v35 = vpop.f32.mrf.mxu2 }
 0x135   :  { %v469_v36 = vpack.c.bf16 %v467_v34, %v467_v34  ;;  %v424_v37 = vadd.f32 %v423_v35, %v250_v33  ;;  %v436_v38 = vpop.f32.mrf.mxu3 }
 0x136   :  { %v451_v39 = vpop.f32.mrf.mxu0 }
 0x137   :  { %v437_v40 = vadd.f32 %v436_v38, %v424_v37  ;;  %v464_v41 = vpop.f32.mrf.mxu1  ;;  %623 = vmatmul.bf16.vlgmr.msrb.gmra.mxu3 %v469_v36 }
 0x139   :  { %v466_v42 = vmax.f32 %v437_v40, 0.0 }
 0x13b   :  { %v468_v43 = vpack.c.bf16 %v466_v42, %v466_v42 }
 0x13c   :  { %v425_v44 = vpop.f32.mrf.mxu2 }
 0x13d   :  { %v438_v45 = vpop.f32.mrf.mxu3  ;;  %610 = vmatmul.bf16.vlgmr.msrb.gmra.mxu2 %v468_v43 }
 0x1ba   :  { %v624_v53 = vpop.f32.mrf.mxu3 }
 0x1c0   :  { %v611_v55 = vpop.f32.mrf.mxu2 }
 0x1c1   :  { %v612_v56 = vadd.f32 %v1139_v54, %v611_v55 }
 0x1c2   :  { %v626_v57 = vpop.f32.mrf.mxu3 }
 0x1c3   :  { %v625_v58 = vadd.f32 %v624_v53, %v612_v56 }
 0x1c5   :  { %v628_v59 = vmax.f32 %v625_v58, 0.0 }
 0x1c7   :  { %v629_v60 = vpack.c.bf16 %v628_v59, %v628_v59 }
 0x1c8   :  { %v613_v61 = vpop.f32.mrf.mxu2 }
 0x1c9   :  { %706 = vmatmul.bf16.vlgmr.msra.gmra.mxu0 %v629_v60 }
 0x246   :  { %v707_v0 = vpop.f32.mrf.mxu0 }
 0x247   :  { %v708_v1 = vadd.f32 %v1140_v63, %v707_v0 }
 0x249   :  { %v711_v2 = vmax.f32 %v708_v1, 0.0 }
 0x24b   :  { %v712_v3 = vpack.c.bf16 %v711_v2, %v711_v2 }
 0x24d   :  { %1061 = vmatmul.msk.bf16.vlgmr.msra.gmra.mxu1 %vm182_vm0, %v712_v3 }
 0x24e   :  { %v709_v4 = vpop.f32.mrf.mxu0 }
 0x2ca   :  { %v761_v6 = vpop.f32.mrf.mxu1 }
 0x2cb   :  { %v762_v7 = vadd.f32 %v1141_v5, %v761_v6 }
 0x2cd   :  { %766 = vst.msk [vmem:[#allocation13] sm:$0xff] %vm765_vm1, %v762_v7 }
 0x2ce   :  { %777 = dma.vmem_to_hbm [thread:$0]  %s773_s2, 128, %s775_s13, [#allocation4]  }
 0x2d2   :  { %v763_v8 = vpop.f32.mrf.mxu1 }
 0x2d3   :  { %1318 = dma.done.wait [#allocation4], 128  }
 0x2d4   :  { %1319 = vsyncadd [#allocation4], 4294967168 }
 0x2d5   :  { %782 = vsyncpa [#allocation3], 1 }
 0x2d6   :  { %783 = vsyncpa [#allocation6], 1 }
 0x2d7   :  { %784 = vsyncpa [#allocation9], 1 }
 0x2d8   :  { %785 = vsyncpa [#allocation12], 1 }
 0x2d9   :  { %786 = vsyncpa [#allocation4], 1 }

</bundles_post_ra>
